<compile_context>
chip_gen: v5e
topology: v5e:2x2
jax: 0.10.0
libtpu: 0.0.40
codegen_flags: <defaults>
</compile_context>

<pallas_src>
import functools

import jax
import jax.numpy as jnp
from jax.experimental import pallas as pl
from jax.experimental.pallas import tpu as pltpu


def _round_up(x, m):
    return ((x + m - 1) // m) * m


def _distill_kernel(t_ref, st_ref, out_ref, num_acc, cnt_acc, *,
                    iou_threshold, t_total, s_total, t_tile, s_tile,
                    mask_rows, mask_cols):
    i = pl.program_id(0)          # teacher-tile index (parallel / megacore)
    j = pl.program_id(1)          # student-tile index (reduction, last)

    t = t_ref[...]                 # (tT, 4)  teacher boxes (rows)
    st = st_ref[...]               # (4, tS)  student boxes (coords x lanes)

    # teacher coords -> column vectors [tT, 1]; student coords -> rows [1, tS]
    tx1, ty1, tx2, ty2 = t[:, 0:1], t[:, 1:2], t[:, 2:3], t[:, 3:4]
    sx1, sy1, sx2, sy2 = st[0:1, :], st[1:2, :], st[2:3, :], st[3:4, :]

    # ---- pairwise intersection / union (divide-free IoU threshold) ----
    ix1 = jnp.maximum(tx1, sx1)
    iy1 = jnp.maximum(ty1, sy1)
    ix2 = jnp.minimum(tx2, sx2)
    iy2 = jnp.minimum(ty2, sy2)
    inter = jnp.maximum(ix2 - ix1, 0.0) * jnp.maximum(iy2 - iy1, 0.0)
    t_area = (tx2 - tx1) * (ty2 - ty1)          # (tT, 1)
    s_area = (sx2 - sx1) * (sy2 - sy1)          # (1, tS)
    union = t_area + s_area - inter             # (tT, tS)
    # iou >= thr  <=>  inter >= thr*union, guarded by union > 0 (kills 0/0 and
    # zero-padded boxes; matches the reference for well-formed boxes).
    mask = (inter >= iou_threshold * union) & (union > 0.0)

    # ---- mask out zero-padded remainder rows / cols (static decision) ----
    if mask_rows:
        row_ids = jax.lax.broadcasted_iota(jnp.int32, (t_tile, 1), 0) + i * t_tile
        mask = mask & (row_ids < t_total)
    if mask_cols:
        col_ids = jax.lax.broadcasted_iota(jnp.int32, (1, s_tile), 1) + j * s_tile
        mask = mask & (col_ids < s_total)
    maskf = mask.astype(jnp.float32)

    # ---- pairwise squared distance via the MXU ----
    # ||t_i - s_j||^2 = ||t_i||^2 + ||s_j||^2 - 2 <t_i, s_j>
    # (boxes are translation-centered in the wrapper to avoid cancellation)
    t_norm = jnp.sum(t * t, axis=1, keepdims=True)      # (tT, 1)
    s_norm = jnp.sum(st * st, axis=0, keepdims=True)    # (1, tS)
    cross = jnp.dot(t, st, preferred_element_type=jnp.float32)   # (tT, tS) MXU
    sqdist = t_norm + s_norm - 2.0 * cross

    # ---- sublane fold: tT rows -> 8 sublanes with pure vreg adds (no XLU),
    #      then a single small RMW on the (8, tS) accumulators ----
    nblk = t_tile // 8
    num_fold = jnp.sum((maskf * sqdist).reshape(nblk, 8, s_tile), axis=0)
    cnt_fold = jnp.sum(maskf.reshape(nblk, 8, s_tile), axis=0)

    @pl.when(j == 0)
    def _():
        num_acc[...] = num_fold
        cnt_acc[...] = cnt_fold

    @pl.when(j != 0)
    def _():
        num_acc[...] += num_fold
        cnt_acc[...] += cnt_fold

    # ---- epilogue: one sublane-reduce per T tile, lane-dense output rows ----
    @pl.when(j == pl.num_programs(1) - 1)
    def _():
        out_ref[0:1, :] = jnp.sum(num_acc[...], axis=0, keepdims=True)
        out_ref[1:2, :] = jnp.sum(cnt_acc[...], axis=0, keepdims=True)


def distillation_loss(teacher_outputs, student_outputs,
                      alpha=0.5, temperature=2.0, iou_threshold=0.5,
                      t_tile_max=256, s_tile_max=2048):
    """Mirrors DistillationLoss.forward (alpha/temperature/scores unused)."""
    del alpha, temperature  # unused by the reference forward pass
    teacher_boxes = jnp.asarray(teacher_outputs[0]["boxes"], jnp.float32)  # [T,4]
    student_boxes = jnp.asarray(student_outputs[0]["boxes"], jnp.float32)  # [S,4]
    T = int(teacher_boxes.shape[0])
    S = int(student_boxes.shape[0])
    if T == 0 or S == 0:
        return jnp.float32(0.0)

    # Translation-only centering (same shift on x1/x2 and on y1/y2): preserves
    # IoU and all pairwise differences exactly, but removes the catastrophic
    # cancellation in ||t||^2+||s||^2-2<t,s> for pixel-scale coordinates.
    cx = 0.5 * jnp.mean(teacher_boxes[:, 0] + teacher_boxes[:, 2])
    cy = 0.5 * jnp.mean(teacher_boxes[:, 1] + teacher_boxes[:, 3])
    shift = jnp.stack([cx, cy, cx, cy])
    teacher_c = teacher_boxes - shift[None, :]
    student_c = student_boxes - shift[None, :]

    # Tile selection: teacher tile targets >= 2 tiles on the parallel axis
    # (v7x megacore) without gratuitous padding; student tile is large to
    # amortize per-step overhead (kernel is VALU-bound, not VMEM-bound now
    # that the accumulators are only (8, s_tile)).
    t_tile = min(t_tile_max, _round_up(max((T + 1) // 2, 8), 8))
    s_tile = min(s_tile_max, _round_up(S, 128))
    t_pad = _round_up(T, t_tile)
    s_pad = _round_up(S, s_tile)
    n_t = t_pad // t_tile
    n_s = s_pad // s_tile

    # zero-pad to tile multiples; padding is masked inside the kernel.
    t_p = jnp.zeros((t_pad, 4), jnp.float32).at[:T].set(teacher_c)
    s_p = jnp.zeros((s_pad, 4), jnp.float32).at[:S].set(student_c)
    st_p = s_p.T                                # (4, s_pad): student idx on lanes

    kernel = functools.partial(
        _distill_kernel,
        iou_threshold=float(iou_threshold),
        t_total=T, s_total=S, t_tile=t_tile, s_tile=s_tile,
        mask_rows=(t_pad > T), mask_cols=(s_pad > S))

    # TODO(synk): for many small images, add a leading "image" parallel grid
    # axis so several detections share one pallas_call (amortizes launch/DMA
    # overhead); the reference module only consumes outputs[0].
    partials = pl.pallas_call(
        kernel,
        out_shape=jax.ShapeDtypeStruct((n_t, 2, s_tile), jnp.float32),
        grid_spec=pltpu.PrefetchScalarGridSpec(
            num_scalar_prefetch=0,
            grid=(n_t, n_s),
            in_specs=[
                pl.BlockSpec((t_tile, 4), lambda i, j: (i, 0)),
                pl.BlockSpec((4, s_tile), lambda i, j: (0, j)),
            ],
            out_specs=pl.BlockSpec((None, 2, s_tile), lambda i, j: (i, 0, 0)),
            scratch_shapes=[
                pltpu.VMEM((8, s_tile), jnp.float32),   # folded masked sqdist sum
                pltpu.VMEM((8, s_tile), jnp.float32),   # folded match count
            ],
        ),
        compiler_params=pltpu.CompilerParams(
            dimension_semantics=("parallel", "arbitrary"),
            vmem_limit_bytes=32 * 1024 * 1024,
        ),
    )(t_p, st_p)

    num = jnp.sum(partials[:, 0, :])
    cnt = jnp.sum(partials[:, 1, :])
    # MSE over the gathered (num_matches, 4) rows == num / (4 * num_matches);
    # 0.0 when there are no matches (matches the torch early-return path).
    return jnp.where(cnt > 0.0, num / jnp.maximum(4.0 * cnt, 1.0),
                     jnp.float32(0.0))


def _reference_loss(teacher_boxes, student_boxes, iou_threshold):
    """Pure-JAX reference mirroring the torch masked-MSE formulation."""
    t = teacher_boxes[:, None, :]
    s = student_boxes[None, :, :]
    x1 = jnp.maximum(t[..., 0], s[..., 0])
    y1 = jnp.maximum(t[..., 1], s[..., 1])
    x2 = jnp.minimum(t[..., 2], s[..., 2])
    y2 = jnp.minimum(t[..., 3], s[..., 3])
    inter = jnp.maximum(x2 - x1, 0.0) * jnp.maximum(y2 - y1, 0.0)
    ta = (t[..., 2] - t[..., 0]) * (t[..., 3] - t[..., 1])
    sa = (s[..., 2] - s[..., 0]) * (s[..., 3] - s[..., 1])
    union = ta + sa - inter
    iou = inter / union
    mask = (iou >= iou_threshold).astype(jnp.float32)
    sqdist = jnp.sum((t - s) ** 2, axis=-1)
    num = jnp.sum(mask * sqdist)
    cnt = jnp.sum(mask)
    return jnp.where(cnt > 0.0, num / jnp.maximum(4.0 * cnt, 1.0), 0.0)


if __name__ == "__main__":
    key = jax.random.PRNGKey(0)

    # Two small deterministic cases: (8, 8) exercises n_t=1 / column masking,
    # (44, 40) exercises n_t=2 (megacore path) plus row + column masking.
    for (T, S) in [(8, 8), (44, 40)]:
        kk = jax.random.fold_in(key, T * 1000 + S)
        k_ctr, k_wh, k_noise, k_sc = jax.random.split(kk, 4)

        # synthetic detections: teacher boxes in [0, 1]
        ctr = jax.random.uniform(k_ctr, (T, 2), minval=0.2, maxval=0.8)
        wh = jax.random.uniform(k_wh, (T, 2), minval=0.15, maxval=0.35)
        teacher_boxes = jnp.concatenate([ctr - wh / 2.0, ctr + wh / 2.0],
                                        axis=-1).astype(jnp.float32)       # [T, 4]
        # student boxes = perturbed teacher boxes -> some IoU >= 0.5 matches
        student_boxes = (teacher_boxes[:S]
                         + 0.02 * jax.random.normal(k_noise, (S, 4))).astype(jnp.float32)

        teacher_outputs = [{"boxes": teacher_boxes,
                            "scores": jax.random.uniform(k_sc, (T,))}]
        student_outputs = [{"boxes": student_boxes,
                            "scores": jax.random.uniform(k_sc, (S,))}]

        loss = distillation_loss(teacher_outputs, student_outputs,
                                 alpha=0.5, temperature=2.0, iou_threshold=0.5)
        jax.block_until_ready(loss)

        ref = _reference_loss(teacher_boxes, student_boxes, 0.5)
        jax.block_until_ready(ref)
        assert abs(float(loss) - float(ref)) <= 1e-5 + 1e-2 * abs(float(ref)), (
            T, S, float(loss), float(ref))

    print("KERNEL_OK")
</pallas_src>

<mosaic_0001>
module attributes {stable_mosaic.version = 11 : i64} {
  func.func @_distill_kernel(%arg0: i32, %arg1: i32, %arg2: memref<8x4xf32, #tpu.memory_space<vmem>>, %arg3: memref<4x128xf32, #tpu.memory_space<vmem>>, %arg4: memref<1x2x128xf32, #tpu.memory_space<vmem>>, %arg5: memref<8x128xf32, #tpu.memory_space<vmem>>, %arg6: memref<8x128xf32, #tpu.memory_space<vmem>>) attributes {dimension_semantics = [#tpu.dimension_semantics<parallel>, #tpu.dimension_semantics<arbitrary>], iteration_bounds = array<i64: 1, 1>, scalar_prefetch = 0 : i64, scratch_operands = 2 : i64, tpu.core_type = #tpu.core_type<tc>, window_params = [{transform_indices = @transform_0, window_bounds = array<i64: 8, 4>}, {transform_indices = @transform_1, window_bounds = array<i64: 4, 128>}, {transform_indices = @transform_2, window_bounds = array<i64: 1, 2, 128>}]} {
    %c0 = arith.constant 0 : index
    %c0_0 = arith.constant 0 : index
    %0 = vector.load %arg2[%c0, %c0_0] : memref<8x4xf32, #tpu.memory_space<vmem>>, vector<8x4xf32>
    %c0_1 = arith.constant 0 : index
    %c0_2 = arith.constant 0 : index
    %1 = vector.load %arg3[%c0_1, %c0_2] : memref<4x128xf32, #tpu.memory_space<vmem>>, vector<4x128xf32>
    %2 = vector.extract_strided_slice %0 {offsets = [0, 0], sizes = [8, 1], strides = [1, 1]} : vector<8x4xf32> to vector<8x1xf32>
    %3 = vector.extract_strided_slice %0 {offsets = [0, 1], sizes = [8, 1], strides = [1, 1]} : vector<8x4xf32> to vector<8x1xf32>
    %4 = vector.extract_strided_slice %0 {offsets = [0, 2], sizes = [8, 1], strides = [1, 1]} : vector<8x4xf32> to vector<8x1xf32>
    %5 = vector.extract_strided_slice %0 {offsets = [0, 3], sizes = [8, 1], strides = [1, 1]} : vector<8x4xf32> to vector<8x1xf32>
    %6 = vector.extract_strided_slice %1 {offsets = [0, 0], sizes = [1, 128], strides = [1, 1]} : vector<4x128xf32> to vector<1x128xf32>
    %7 = vector.extract_strided_slice %1 {offsets = [1, 0], sizes = [1, 128], strides = [1, 1]} : vector<4x128xf32> to vector<1x128xf32>
    %8 = vector.extract_strided_slice %1 {offsets = [2, 0], sizes = [1, 128], strides = [1, 1]} : vector<4x128xf32> to vector<1x128xf32>
    %9 = vector.extract_strided_slice %1 {offsets = [3, 0], sizes = [1, 128], strides = [1, 1]} : vector<4x128xf32> to vector<1x128xf32>
    %10 = vector.broadcast %2 : vector<8x1xf32> to vector<8x128xf32>
    %11 = vector.broadcast %6 : vector<1x128xf32> to vector<8x128xf32>
    %12 = arith.maximumf %10, %11 : vector<8x128xf32>
    %13 = vector.broadcast %3 : vector<8x1xf32> to vector<8x128xf32>
    %14 = vector.broadcast %7 : vector<1x128xf32> to vector<8x128xf32>
    %15 = arith.maximumf %13, %14 : vector<8x128xf32>
    %16 = vector.broadcast %4 : vector<8x1xf32> to vector<8x128xf32>
    %17 = vector.broadcast %8 : vector<1x128xf32> to vector<8x128xf32>
    %18 = arith.minimumf %16, %17 : vector<8x128xf32>
    %19 = vector.broadcast %5 : vector<8x1xf32> to vector<8x128xf32>
    %20 = vector.broadcast %9 : vector<1x128xf32> to vector<8x128xf32>
    %21 = arith.minimumf %19, %20 : vector<8x128xf32>
    %22 = arith.subf %18, %12 : vector<8x128xf32>
    %cst = arith.constant 0.000000e+00 : f32
    %23 = vector.broadcast %cst : f32 to vector<8x128xf32>
    %24 = arith.maximumf %22, %23 : vector<8x128xf32>
    %25 = arith.subf %21, %15 : vector<8x128xf32>
    %cst_3 = arith.constant 0.000000e+00 : f32
    %26 = vector.broadcast %cst_3 : f32 to vector<8x128xf32>
    %27 = arith.maximumf %25, %26 : vector<8x128xf32>
    %28 = arith.mulf %24, %27 : vector<8x128xf32>
    %29 = arith.subf %4, %2 : vector<8x1xf32>
    %30 = arith.subf %5, %3 : vector<8x1xf32>
    %31 = arith.mulf %29, %30 : vector<8x1xf32>
    %32 = arith.subf %8, %6 : vector<1x128xf32>
    %33 = arith.subf %9, %7 : vector<1x128xf32>
    %34 = arith.mulf %32, %33 : vector<1x128xf32>
    %35 = vector.broadcast %31 : vector<8x1xf32> to vector<8x128xf32>
    %36 = vector.broadcast %34 : vector<1x128xf32> to vector<8x128xf32>
    %37 = arith.addf %35, %36 : vector<8x128xf32>
    %38 = arith.subf %37, %28 : vector<8x128xf32>
    %cst_4 = arith.constant 5.000000e-01 : f32
    %39 = vector.broadcast %cst_4 : f32 to vector<8x128xf32>
    %40 = arith.mulf %39, %38 : vector<8x128xf32>
    %41 = arith.cmpf oge, %28, %40 : vector<8x128xf32>
    %cst_5 = arith.constant 0.000000e+00 : f32
    %42 = vector.broadcast %cst_5 : f32 to vector<8x128xf32>
    %43 = arith.cmpf ogt, %38, %42 : vector<8x128xf32>
    %44 = arith.andi %41, %43 : vector<8x128xi1>
    %45 = tpu.iota {dimensions = array<i32: 1>} : vector<1x128xi32>
    %c128_i32 = arith.constant 128 : i32
    %46 = arith.muli %arg1, %c128_i32 : i32
    %47 = vector.broadcast %46 : i32 to vector<1x128xi32>
    %48 = arith.addi %45, %47 : vector<1x128xi32>
    %c8_i32 = arith.constant 8 : i32
    %49 = vector.broadcast %c8_i32 : i32 to vector<1x128xi32>
    %50 = arith.cmpi slt, %48, %49 : vector<1x128xi32>
    %51 = vector.broadcast %50 : vector<1x128xi1> to vector<8x128xi1>
    %52 = arith.andi %44, %51 : vector<8x128xi1>
    %53 = arith.extui %52 : vector<8x128xi1> to vector<8x128xi32>
    %54 = arith.sitofp %53 : vector<8x128xi32> to vector<8x128xf32>
    %55 = arith.mulf %0, %0 : vector<8x4xf32>
    %cst_6 = arith.constant dense<0.000000e+00> : vector<8xf32>
    %56 = vector.multi_reduction <add>, %55, %cst_6 [1] : vector<8x4xf32> to vector<8xf32>
    %57 = vector.shape_cast %56 : vector<8xf32> to vector<8x1xf32>
    %58 = arith.mulf %1, %1 : vector<4x128xf32>
    %cst_7 = arith.constant dense<0.000000e+00> : vector<128xf32>
    %59 = vector.multi_reduction <add>, %58, %cst_7 [0] : vector<4x128xf32> to vector<128xf32>
    %60 = vector.shape_cast %59 : vector<128xf32> to vector<1x128xf32>
    %cst_8 = arith.constant dense<0.000000e+00> : vector<8x128xf32>
    %61 = tpu.matmul %0, %1, %cst_8 {dimension_numbers = #tpu.dot_dimension_numbers<[1], [0], [0], [1], [0, 0, 1, 1], [], []>} : vector<8x4xf32>, vector<4x128xf32>, vector<8x128xf32> -> vector<8x128xf32>
    %62 = vector.broadcast %57 : vector<8x1xf32> to vector<8x128xf32>
    %63 = vector.broadcast %60 : vector<1x128xf32> to vector<8x128xf32>
    %64 = arith.addf %62, %63 : vector<8x128xf32>
    %cst_9 = arith.constant 2.000000e+00 : f32
    %65 = vector.broadcast %cst_9 : f32 to vector<8x128xf32>
    %66 = arith.mulf %65, %61 : vector<8x128xf32>
    %67 = arith.subf %64, %66 : vector<8x128xf32>
    %68 = arith.mulf %54, %67 : vector<8x128xf32>
    %69 = vector.shape_cast %68 : vector<8x128xf32> to vector<1x8x128xf32>
    %cst_10 = arith.constant dense<0.000000e+00> : vector<8x128xf32>
    %70 = vector.multi_reduction <add>, %69, %cst_10 [0] : vector<1x8x128xf32> to vector<8x128xf32>
    %71 = vector.shape_cast %54 : vector<8x128xf32> to vector<1x8x128xf32>
    %cst_11 = arith.constant dense<0.000000e+00> : vector<8x128xf32>
    %72 = vector.multi_reduction <add>, %71, %cst_11 [0] : vector<1x8x128xf32> to vector<8x128xf32>
    %c0_i32 = arith.constant 0 : i32
    %73 = arith.cmpi eq, %arg1, %c0_i32 : i32
    %74 = arith.extui %73 : i1 to i32
    %c0_i32_12 = arith.constant 0 : i32
    %75 = arith.cmpi ne, %74, %c0_i32_12 : i32
    scf.if %75 {
      %c0_17 = arith.constant 0 : index
      %c0_18 = arith.constant 0 : index
      %82 = vector.load %arg5[%c0_17, %c0_18] : memref<8x128xf32, #tpu.memory_space<vmem>>, vector<8x128xf32>
      tpu.vector_store %arg5[%c0_17, %c0_18], %70 {strides = array<i32>} : memref<8x128xf32, #tpu.memory_space<vmem>>, vector<8x128xf32>,
      %c0_19 = arith.constant 0 : index
      %c0_20 = arith.constant 0 : index
      %83 = vector.load %arg6[%c0_19, %c0_20] : memref<8x128xf32, #tpu.memory_space<vmem>>, vector<8x128xf32>
      tpu.vector_store %arg6[%c0_19, %c0_20], %72 {strides = array<i32>} : memref<8x128xf32, #tpu.memory_space<vmem>>, vector<8x128xf32>,
    } else {
    }
    %c0_i32_13 = arith.constant 0 : i32
    %76 = arith.cmpi ne, %arg1, %c0_i32_13 : i32
    %77 = arith.extui %76 : i1 to i32
    %c0_i32_14 = arith.constant 0 : i32
    %78 = arith.cmpi ne, %77, %c0_i32_14 : i32
    scf.if %78 {
      %c0_17 = arith.constant 0 : index
      %c0_18 = arith.constant 0 : index
      %82 = vector.load %arg5[%c0_17, %c0_18] : memref<8x128xf32, #tpu.memory_space<vmem>>, vector<8x128xf32>
      %83 = arith.addf %82, %70 : vector<8x128xf32>
      %c0_19 = arith.constant 0 : index
      %c0_20 = arith.constant 0 : index
      %84 = vector.load %arg5[%c0_19, %c0_20] : memref<8x128xf32, #tpu.memory_space<vmem>>, vector<8x128xf32>
      tpu.vector_store %arg5[%c0_19, %c0_20], %83 {strides = array<i32>} : memref<8x128xf32, #tpu.memory_space<vmem>>, vector<8x128xf32>,
      %c0_21 = arith.constant 0 : index
      %c0_22 = arith.constant 0 : index
      %85 = vector.load %arg6[%c0_21, %c0_22] : memref<8x128xf32, #tpu.memory_space<vmem>>, vector<8x128xf32>
      %86 = arith.addf %85, %72 : vector<8x128xf32>
      %c0_23 = arith.constant 0 : index
      %c0_24 = arith.constant 0 : index
      %87 = vector.load %arg6[%c0_23, %c0_24] : memref<8x128xf32, #tpu.memory_space<vmem>>, vector<8x128xf32>
      tpu.vector_store %arg6[%c0_23, %c0_24], %86 {strides = array<i32>} : memref<8x128xf32, #tpu.memory_space<vmem>>, vector<8x128xf32>,
    } else {
    }
    %c0_i32_15 = arith.constant 0 : i32
    %79 = arith.cmpi eq, %arg1, %c0_i32_15 : i32
    %80 = arith.extui %79 : i1 to i32
    %c0_i32_16 = arith.constant 0 : i32
    %81 = arith.cmpi ne, %80, %c0_i32_16 : i32
    scf.if %81 {
      %c0_17 = arith.constant 0 : index
      %c0_18 = arith.constant 0 : index
      %82 = vector.load %arg5[%c0_17, %c0_18] : memref<8x128xf32, #tpu.memory_space<vmem>>, vector<8x128xf32>
      %cst_19 = arith.constant dense<0.000000e+00> : vector<128xf32>
      %83 = vector.multi_reduction <add>, %82, %cst_19 [0] : vector<8x128xf32> to vector<128xf32>
      %84 = vector.shape_cast %83 : vector<128xf32> to vector<1x128xf32>
      %c0_20 = arith.constant 0 : index
      %c0_21 = arith.constant 0 : index
      %c0_22 = arith.constant 0 : index
      %85 = vector.load %arg4[%c0_20, %c0_21, %c0_22] : memref<1x2x128xf32, #tpu.memory_space<vmem>>, vector<1x1x128xf32>
      %86 = vector.shape_cast %85 : vector<1x1x128xf32> to vector<1x128xf32>
      %87 = vector.shape_cast %84 : vector<1x128xf32> to vector<1x1x128xf32>
      tpu.vector_store %arg4[%c0_20, %c0_21, %c0_22], %87 {strides = array<i32>} : memref<1x2x128xf32, #tpu.memory_space<vmem>>, vector<1x1x128xf32>,
      %c0_23 = arith.constant 0 : index
      %c0_24 = arith.constant 0 : index
      %88 = vector.load %arg6[%c0_23, %c0_24] : memref<8x128xf32, #tpu.memory_space<vmem>>, vector<8x128xf32>
      %cst_25 = arith.constant dense<0.000000e+00> : vector<128xf32>
      %89 = vector.multi_reduction <add>, %88, %cst_25 [0] : vector<8x128xf32> to vector<128xf32>
      %90 = vector.shape_cast %89 : vector<128xf32> to vector<1x128xf32>
      %c0_26 = arith.constant 0 : index
      %c1 = arith.constant 1 : index
      %c0_27 = arith.constant 0 : index
      %91 = vector.load %arg4[%c0_26, %c1, %c0_27] : memref<1x2x128xf32, #tpu.memory_space<vmem>>, vector<1x1x128xf32>
      %92 = vector.shape_cast %91 : vector<1x1x128xf32> to vector<1x128xf32>
      %93 = vector.shape_cast %90 : vector<1x128xf32> to vector<1x1x128xf32>
      tpu.vector_store %arg4[%c0_26, %c1, %c0_27], %93 {strides = array<i32>} : memref<1x2x128xf32, #tpu.memory_space<vmem>>, vector<1x1x128xf32>,
    } else {
    }
    return
  }
  func.func @transform_0(%arg0: i32, %arg1: i32) -> (i32, i32) {
    %c0_i32 = arith.constant 0 : i32
    %c0_i32_0 = arith.constant 0 : i32
    return %arg0, %c0_i32 : i32, i32
  }
  func.func @transform_1(%arg0: i32, %arg1: i32) -> (i32, i32) {
    %c0_i32 = arith.constant 0 : i32
    %c0_i32_0 = arith.constant 0 : i32
    return %c0_i32, %arg1 : i32, i32
  }
  func.func @transform_2(%arg0: i32, %arg1: i32) -> (i32, i32, i32) {
    %c0_i32 = arith.constant 0 : i32
    %c0_i32_0 = arith.constant 0 : i32
    %c0_i32_1 = arith.constant 0 : i32
    return %arg0, %c0_i32, %c0_i32_0 : i32, i32, i32
  }
}

</mosaic_0001>

<bundles_post_ra>
// kernel: tpu_custom_call.1
= control target key start
LH: loop header
LB: loop body
LE: loop exit
PB: predicated region body
PF: predicated region fallthrough
CT: control target
= control target key end

     0   :  { %s257_s0 = inlined_call_operand.vmem [shape: f32[8,4], index: 0, kind: input, shape index: {}]   ;;  %s258_s1 = inlined_call_operand.vmem [shape: f32[4,128], index: 1, kind: input, shape index: {}]   ;;  %s259_s2 = inlined_call_operand.hbm [shape: f32[1,2,128], index: 2, kind: output, shape index: {}]  }
   0x1   :  { %v12_v0 = vld [vmem:[%s257_s0] sm:$0xff] }
   0x2   :  { %7 = vsyncpa [#allocation5], 0  ;;  %s221_s11 = smov 2   ;;  %v13_v1 = vld [vmem:[%s258_s1] sm:$0xf]  ;;  %v222_v2 = vmov 0   ;;  %v84_v8 = vmul.f32 %v12_v0, %v12_v0  ;;  %v73_v40 = vlaneseq }
   0x3   :  { %44 = vrot.lane.b32.xlu0 %v12_v0, %s221_s11  ;;  %190 = vset.pattern.permute.xlu1 %v222_v2  ;;  %v223_v3 = vmov 2   ;;  %vm90_vm0 = vcmask 1043456   ;;  %vm85_vm1 = vcmask 31744   ;;  %v224_v4 = vmov 1   ;;  %s226_s0 = smov 127   ;;  %s228_s1 = smov [#allocation4]  }
   0x4   :  { %192 = vset.pattern.permute.xlu2 %v223_v3  ;;  %16 = vperm.xlu1 %190, %v12_v0   ;;  %v225_v5 = vmov 3   ;;  %v86_v9 = vsel %vm85_vm1, %v84_v8, 0.0  ;;  %v89_v12 = vmul.f32 %v13_v1, %v13_v1  ;;  %v54_v17 = vrot.slane %v13_v1, 6  ;;  %s168_s14 = sshll.u32 %s228_s1, 4  ;;  %s170_s17 = sshll.u32 %s259_s2, 4  ;;  %s169_s14 = int_to_ptr.vmem [resolvable:$true] %s168_s14  ;;  %s171_s17 = int_to_ptr.hbm [resolvable:$true] %s170_s17 }
   0x5   :  { %28 = vperm.xlu2 %192, %v12_v0   ;;  %180 = vmatpush.msk.msra.mxu0 %vm90_vm0, %v13_v1  ;;  %v31_v19 = vperm.slane %v13_v1, 2  ;;  %v19_v20 = vperm.slane %v13_v1, 0  ;;  %v37_v21 = vperm.slane %v13_v1, 3  ;;  %v25_v22 = vperm.slane %v13_v1, 1 }
   0x6   :  { %194 = vset.pattern.permute.xlu0 %v223_v3  ;;  %181 = vmatmul.msk.f32.vlgmr.msra.gmra.mxu0 %vm85_vm1, %v12_v0  ;;  %v91_v13 = vsel %vm90_vm0, %v89_v12, 0.0  ;;  %v56_v23 = vsub.f32 %v13_v1, %v54_v17  ;;  %v74_v47 = vand.u32 127, %v73_v40  ;;  %v227_v53 = vmov 0.0  }
   0x7   :  { %v92_v16 = vrot.slane %v91_v13, 4 }
   0x8   :  { %v58_v31 = vrot.slane %v56_v23, 1  ;;  %vm78_vm2 = vcmp.lt.s32.totalorder %v74_v47, 8 }
   0x9   :  { %v93_v18 = vadd.f32 %v92_v16, %v91_v13 }
   0xa   :  { %v60_v35 = vmul.f32 %v58_v31, %v56_v23 }
   0xb   :  { %v94_v26 = vrot.slane %v93_v18, 2 }
   0xc   :  { %191 = vset.pattern.permute.xlu1 %v224_v4  ;;  %v66_v39 = vperm.slane %v60_v35, 2 }
   0xd   :  { %193 = vset.pattern.permute.xlu2 %v225_v5  ;;  %22 = vperm.xlu1 %191, %v12_v0   ;;  %v95_v32 = vadd.f32 %v94_v26, %v93_v18 }
   0xe   :  { %34 = vperm.xlu2 %193, %v12_v0  }
   0xf   :  { %v96_v36 = vrot.slane %v95_v32, 1 }
  0x11   :  { %v97_v42 = vadd.f32 %v96_v36, %v95_v32 }
  0x37   :  { %87 = vadd.xlane.f32.xlu1 %v86_v9 }
  0x5f   :  { %v29_v14 = vpop.permute.xlu2 %28 }
  0x60   :  { %v32_v27 = vmin.f32 %v29_v14, %v31_v19 }
  0x68   :  { %v35_v24 = vpop.permute.xlu2 %34 }
  0x69   :  { %v38_v29 = vmin.f32 %v35_v24, %v37_v21 }
  0x75   :  { %v45_v6 = vpop.permute.xlu0 %44 }
  0x76   :  { %v47_v7 = vsub.f32 %v12_v0, %v45_v6  ;;  %v17_v15 = vpop.permute.xlu1 %16 }
  0x77   :  { %v20_v28 = vmax.f32 %v17_v15, %v19_v20 }
  0x78   :  { %49 = vrot.lane.b32.xlu0 %v47_v7, %s226_s0 }
  0x79   :  { %v39_v33 = vsub.f32 %v32_v27, %v20_v28 }
  0x7b   :  { %v40_v37 = vmax.f32 %v39_v33, 0.0 }
  0x7f   :  { %v23_v25 = vpop.permute.xlu1 %22 }
  0x80   :  { %v26_v30 = vmax.f32 %v23_v25, %v25_v22 }
  0x82   :  { %v41_v34 = vsub.f32 %v38_v29, %v26_v30 }
  0x83   :  { %v119_v41 = vpop.f32.mrf.mxu0 }
  0x84   :  { %v42_v38 = vmax.f32 %v41_v34, 0.0  ;;  %v123_v49 = vmul.f32 2.0, %v119_v41 }
  0x86   :  { %v43_v45 = vmul.f32 %v42_v38, %v40_v37 }
  0xaa   :  { %v88_v44 = vpop.xlane.xlu1 %87 }
  0xab   :  { %v122_v50 = vadd.f32 %v97_v42, %v88_v44 }
  0xad   :  { %v124_v52 = vsub.f32 %v122_v50, %v123_v49 }
  0xea   :  { %v50_v10 = vpop.permute.xlu0 %49 }
  0xeb   :  { %v52_v11 = vmul.f32 %v50_v10, %v47_v7 }
  0xed   :  { %63 = vperm.xlu0 %194, %v52_v11  }
 0x15f   :  { %v64_v43 = vpop.permute.xlu0 %63 }
 0x160   :  { %v67_v46 = vadd.f32 %v66_v39, %v64_v43 }
 0x162   :  { %v68_v48 = vsub.f32 %v67_v46, %v43_v45 }
 0x164   :  { %v69_v51 = vmul.f32 0.5, %v68_v48  ;;  %vm71_vm4 = vcmp.gt.f32.partialorder %v68_v48, 0.0 }
 0x166   :  { %vm70_vm3 = vcmp.ge.f32.partialorder %v43_v45, %v69_v51 }
 0x167   :  { %vm72_vm5 = vmand %vm70_vm3, %vm71_vm4 }
 0x168   :  { %vm81_vm6 = vmand %vm72_vm5, %vm78_vm2 }
 0x169   :  { %v179_v54 = vsel %vm81_vm6, 1.0, %v227_v53 }
 0x16a   :  { %v156_v55 = vrot.slane %v179_v54, 4  ;;  %v125_v56 = vmul.f32 %v179_v54, %v124_v52 }
 0x16c   :  { %v157_v57 = vadd.f32 %v179_v54, %v156_v55  ;;  %v148_v58 = vrot.slane %v125_v56, 4 }
 0x16e   :  { %v149_v59 = vadd.f32 %v148_v58, %v125_v56  ;;  %v158_v60 = vrot.slane %v157_v57, 2 }
 0x170   :  { %v150_v61 = vrot.slane %v149_v59, 2  ;;  %v159_v62 = vadd.f32 %v158_v60, %v157_v57 }
 0x172   :  { %v151_v63 = vadd.f32 %v150_v61, %v149_v59  ;;  %v160_v0 = vrot.slane %v159_v62, 1 }
 0x174   :  { %v152_v1 = vrot.slane %v151_v63, 1  ;;  %v161_v2 = vadd.f32 %v160_v0, %v159_v62 }
 0x176   :  { %v153_v3 = vadd.f32 %v152_v1, %v151_v63  ;;  %162 = vst [vmem:[#allocation4 + $0x1] sm:$0x1] %v161_v2 }
 0x178   :  { %154 = vst [vmem:[#allocation4] sm:$0x1] %v153_v3 }
 0x179   :  { %173 = dma.vmem_to_hbm [thread:$0]  %s169_s14, 32, %s171_s17, [#allocation5]  }
 0x17a   :  { %219 = dma.done.wait [#allocation5], 32  }
 0x17b   :  { %220 = vsyncadd [#allocation5], 4294967264 }
 0x17c   :  { %178 = vsyncpa [#allocation5], 1 }

</bundles_post_ra>
